<compile_context>
chip_gen: v7x
topology: tpu7x:2x2x1
jax: 0.10.0
libtpu: 0.0.40
codegen_flags: <defaults>
</compile_context>

<pallas_src>
import math
from functools import partial

import jax
import jax.numpy as jnp
from jax import lax
from jax.experimental import pallas as pl
from jax.experimental.pallas import tpu as pltpu


_NEG_INF = -1e30  # finite sentinel: keeps partially -inf-masked rows NaN-free


def _sublane_align(dtype):
    """Sublane packing of the dtype: 8 rows (f32), 16 (bf16), 32 (int8/fp8)."""
    return max(8, 32 // jnp.dtype(dtype).itemsize)


def _round_up(x, m):
    return ((x + m - 1) // m) * m


def _tile(dim, cap, align):
    """Largest block <= cap that divides `dim` and is a multiple of `align`;
    falls back to the full dim (always a legal BlockSpec block)."""
    if dim <= cap:
        return dim
    t = (cap // align) * align
    while t >= align:
        if dim % t == 0:
            return t
        t -= align
    # TODO(synk): pad awkward L/S dims (with score masking) instead of a
    # full-dim fallback block for very large, indivisible sequence lengths.
    return dim


# ----------------------------------------------------------------------------
# Tiled linear projection:  y = x @ W_t + b      (W_t stored as (Cin, Cout))
# ----------------------------------------------------------------------------
def _linear_kernel(x_ref, wt_ref, b_ref, o_ref, acc_ref):
    kk = pl.program_id(2)

    @pl.when(kk == 0)
    def _():
        acc_ref[...] = jnp.zeros_like(acc_ref)

    acc_ref[...] += jnp.dot(x_ref[...], wt_ref[...],
                            preferred_element_type=jnp.float32)

    @pl.when(kk == pl.num_programs(2) - 1)
    def _():
        o_ref[...] = (acc_ref[...] + b_ref[...].astype(jnp.float32)
                      ).astype(o_ref.dtype)


def linear(x2d, w_t, b2d, *, tm_cap=512, tn_cap=512, tk_cap=1024):
    """x2d: (M, Cin);  w_t: (Cin, Cout) pre-transposed;  b2d: (1, Cout)."""
    M, Cin = x2d.shape
    Cout = w_t.shape[1]
    sub = _sublane_align(x2d.dtype)

    # M (rows) is padded to a tile multiple -- no full-dim fallback that could
    # blow the VMEM budget for awkward M = N*L.
    tm = min(_round_up(tm_cap, sub), _round_up(M, sub))
    Mp = _round_up(M, tm)
    x_in = x2d if Mp == M else jnp.pad(x2d, ((0, Mp - M), (0, 0)))

    # 128-aligned divisors; with 512/1024 caps these are typically multiples
    # of 256 (v6e/v7x MXU tile); 128 is enough for v5e's 4x128^2 MXU.
    tn = _tile(Cout, tn_cap, 128)
    tk = _tile(Cin, tk_cap, 128)
    grid = (Mp // tm, Cout // tn, Cin // tk)

    bx = jnp.dtype(x2d.dtype).itemsize
    bw = jnp.dtype(w_t.dtype).itemsize
    est = (2 * (tm * tk * bx + tk * tn * bw + tn * bw + tm * tn * bx)
           + tm * tn * 4)
    vmem_limit = int(min(max(est + (4 << 20), 16 << 20), 48 << 20))

    out = pl.pallas_call(
        _linear_kernel,
        out_shape=jax.ShapeDtypeStruct((Mp, Cout), x2d.dtype),
        grid_spec=pltpu.PrefetchScalarGridSpec(
            num_scalar_prefetch=0,
            grid=grid,
            in_specs=[
                pl.BlockSpec((tm, tk), lambda i, j, kk: (i, kk)),
                pl.BlockSpec((tk, tn), lambda i, j, kk: (kk, j)),
                pl.BlockSpec((1, tn), lambda i, j, kk: (0, j)),
            ],
            out_specs=pl.BlockSpec((tm, tn), lambda i, j, kk: (i, j)),
            scratch_shapes=[pltpu.VMEM((tm, tn), jnp.float32)],
        ),
        compiler_params=pltpu.CompilerParams(
            dimension_semantics=("parallel", "parallel", "arbitrary"),
            vmem_limit_bytes=vmem_limit),
    )(x_in, w_t, b2d)
    return out if Mp == M else out[:M]


# ----------------------------------------------------------------------------
# Flash-style attention kernel: grid (N, L/tl, S/ts), online softmax over the
# S axis, heads handled inside the kernel, lane-dense (tl, C) output.
# ----------------------------------------------------------------------------
def _attn_kernel(q_ref, k_ref, v_ref, *rest, n_heads, head_dim, inv_d,
                 has_mask, mask_heads, exact_recip):
    if has_mask:
        mask_ref, o_ref, m_sc, l_sc, acc_sc = rest
    else:
        o_ref, m_sc, l_sc, acc_sc = rest

    s_idx = pl.program_id(2)

    @pl.when(s_idx == 0)
    def _():
        m_sc[...] = jnp.full(m_sc.shape, _NEG_INF, dtype=m_sc.dtype)
        l_sc[...] = jnp.zeros(l_sc.shape, dtype=l_sc.dtype)
        acc_sc[...] = jnp.zeros(acc_sc.shape, dtype=acc_sc.dtype)

    # Scale q once per (tl, C) tile in the compute dtype (cheaper than scaling
    # every (tl, ts) score matrix; weak-typed float keeps bf16 as bf16).
    q = q_ref[...] * inv_d
    kx = k_ref[...]
    vx = v_ref[...]

    for h in range(n_heads):                      # heads batched per grid step
        lo = h * head_dim
        hi = lo + head_dim
        qh, kh, vh = q[:, lo:hi], kx[:, lo:hi], vx[:, lo:hi]
        # 'nt'-form contraction over D feeds the MXU without an explicit k.T.
        s = lax.dot_general(qh, kh, (((1,), (1,)), ((), ())),
                            preferred_element_type=jnp.float32)      # (tl, ts)
        if has_mask:
            hm = h if mask_heads > 1 else 0
            # Cast only the (tl, ts) slab being used to f32.
            s = s + mask_ref[hm].astype(jnp.float32)

        m_prev = m_sc[h]                                             # (tl, 1)
        m_new = jnp.maximum(m_prev, jnp.max(s, axis=-1, keepdims=True))
        alpha = jnp.exp(m_prev - m_new)
        p = jnp.exp(s - m_new)
        l_sc[h] = alpha * l_sc[h] + jnp.sum(p, axis=-1, keepdims=True)
        acc_sc[:, lo:hi] = alpha * acc_sc[:, lo:hi] + lax.dot_general(
            p.astype(vh.dtype), vh, (((1,), (0,)), ((), ())),
            preferred_element_type=jnp.float32)                      # (tl, D)
        m_sc[h] = m_new

    @pl.when(s_idx == pl.num_programs(2) - 1)
    def _():
        # NOTE: fully-masked rows (all -inf) give l == 0 -> NaN output,
        # matching the reference softmax behavior.
        direct = (head_dim % 128 == 0)
        for h in range(n_heads):
            lo = h * head_dim
            hi = lo + head_dim
            # EUP reciprocal; exact for f32 outputs per correctness feedback.
            inv_l = pl.reciprocal(l_sc[h], approx=not exact_recip)
            if direct:
                # Lane-aligned per-head store straight to the output tile.
                o_ref[:, lo:hi] = (acc_sc[:, lo:hi] * inv_l).astype(o_ref.dtype)
            else:
                acc_sc[:, lo:hi] = acc_sc[:, lo:hi] * inv_l
        if not direct:
            # Single lane-dense (tl, C) store.
            o_ref[...] = acc_sc[...].astype(o_ref.dtype)


def attention(q_arr, k_arr, v_arr, mask, *, n_heads, inv_d, C,
              q_cblk=0, k_cblk=0, v_cblk=0, out_dtype=None,
              tl_cap=256, ts_cap=512):
    """q_arr: (N, L, Cq); k_arr/v_arr: (N, S, Ck/Cv) -- possibly the same fused
    (.., 3C)/(.., 2C) array; the C-wide channel block used for q/k/v is picked
    by *_cblk.  mask: None or broadcastable to (N, H, L, S) (dims 1 or full),
    any float dtype.  Returns (N, L, C)."""
    N, L = q_arr.shape[0], q_arr.shape[1]
    S = k_arr.shape[1]
    H = n_heads
    D = C // H
    out_dtype = out_dtype if out_dtype is not None else q_arr.dtype
    sub = _sublane_align(q_arr.dtype)

    has_mask = mask is not None
    if has_mask:
        mask = mask.reshape((1,) * (4 - mask.ndim) + mask.shape)
        Nm, Hm, Lm, Sm = mask.shape
        assert Nm in (1, N) and Hm in (1, H) and Lm in (1, L) and Sm in (1, S)
        mbytes = jnp.dtype(mask.dtype).itemsize
    else:
        Nm = Hm = Lm = Sm = 1
        mbytes = 0

    bx = jnp.dtype(q_arr.dtype).itemsize
    bo = jnp.dtype(out_dtype).itemsize

    # Shrink (ts, then tl) until double-buffered blocks + scratch fit ~40 MiB,
    # which closes comfortably under the 48 MiB limit on v7x's 64 MiB VMEM.
    budget = 40 << 20
    tl_c, ts_c = tl_cap, ts_cap
    while True:
        tl = _tile(L, tl_c, sub)
        ts = _tile(S, ts_c, 128)
        m_blk = (Hm * (tl if Lm == L else 1) * (ts if Sm == S else 1) * mbytes
                 if has_mask else 0)
        est = (2 * (tl * C * bx + 2 * ts * C * bx + m_blk + tl * C * bo)
               + tl * C * 4 + 2 * H * tl * 4)
        if est <= budget or (tl_c <= sub and ts_c <= 128):
            break
        if ts_c > 128:
            ts_c //= 2
        else:
            tl_c = max(sub, tl_c // 2)

    # Megacore granularity: expose >= 2 parallel programs for v7x's 2 TCs.
    while (N * (L // tl) < 2 and tl > sub and tl % 2 == 0
           and (tl // 2) % sub == 0 and L % (tl // 2) == 0):
        tl //= 2

    grid = (N, L // tl, S // ts)

    in_specs = [
        pl.BlockSpec((None, tl, C), lambda n, l, s: (n, l, q_cblk)),
        pl.BlockSpec((None, ts, C), lambda n, l, s: (n, s, k_cblk)),
        pl.BlockSpec((None, ts, C), lambda n, l, s: (n, s, v_cblk)),
    ]
    args = [q_arr, k_arr, v_arr]
    if has_mask:
        Lblk = tl if Lm == L else 1
        Sblk = ts if Sm == S else 1

        def m_map(n, l, s):
            # Broadcast size-1 batch/L/S dims via the index_map (block idx 0).
            return (n if Nm > 1 else 0, 0,
                    l if Lm > 1 else 0, s if Sm > 1 else 0)

        in_specs.append(pl.BlockSpec((None, Hm, Lblk, Sblk), m_map))
        args.append(mask)

    kernel = partial(_attn_kernel, n_heads=H, head_dim=D, inv_d=inv_d,
                     has_mask=has_mask, mask_heads=Hm,
                     exact_recip=(jnp.dtype(out_dtype) == jnp.float32))

    return pl.pallas_call(
        kernel,
        out_shape=jax.ShapeDtypeStruct((N, L, C), out_dtype),
        grid_spec=pltpu.PrefetchScalarGridSpec(
            num_scalar_prefetch=0,
            grid=grid,
            in_specs=in_specs,
            out_specs=pl.BlockSpec((None, tl, C), lambda n, l, s: (n, l, 0)),
            scratch_shapes=[
                pltpu.VMEM((H, tl, 1), jnp.float32),   # running row max
                pltpu.VMEM((H, tl, 1), jnp.float32),   # running softmax denom
                pltpu.VMEM((tl, C), jnp.float32),      # running output acc
            ],
        ),
        compiler_params=pltpu.CompilerParams(
            dimension_semantics=("parallel", "parallel", "arbitrary"),
            vmem_limit_bytes=48 * 1024 * 1024),
    )(*args)


# ----------------------------------------------------------------------------
# Module wrapper (parameters + thin reshapes in plain JAX)
# ----------------------------------------------------------------------------
class MultiheadAttentionPallas:
    def __init__(self, embed_dim, n_heads, key, dtype=jnp.float32):
        assert embed_dim % n_heads == 0
        self.embed_dim = embed_dim
        self.n_heads = n_heads
        self.d = (embed_dim // n_heads) ** 0.5

        keys = jax.random.split(key, 8)
        bound = 1.0 / math.sqrt(embed_dim)       # nn.Linear default init bound

        def init_linear(kw, kb):
            # Stored pre-transposed (Cin, Cout): no per-forward w.T needed.
            w_t = jax.random.uniform(kw, (embed_dim, embed_dim), dtype,
                                     -bound, bound)
            b = jax.random.uniform(kb, (1, embed_dim), dtype, -bound, bound)
            return w_t, b

        self.wq_t, self.bq = init_linear(keys[0], keys[1])
        self.wk_t, self.bk = init_linear(keys[2], keys[3])
        self.wv_t, self.bv = init_linear(keys[4], keys[5])
        self.wo_t, self.bo = init_linear(keys[6], keys[7])

        # Fused projection weights (built once at init). Used when C % 128 == 0
        # so the fused (.., 3C)/(.., 2C) result can feed the attention kernel
        # directly with lane-aligned channel blocks (no wrapper slicing copies).
        self.wqkv_t = jnp.concatenate([self.wq_t, self.wk_t, self.wv_t], axis=1)
        self.bqkv = jnp.concatenate([self.bq, self.bk, self.bv], axis=1)
        self.wkv_t = jnp.concatenate([self.wk_t, self.wv_t], axis=1)
        self.bkv = jnp.concatenate([self.bk, self.bv], axis=1)
        self._fusable = (embed_dim % 128 == 0)

    def __call__(self, q, k, v, attn_mask=None):
        N, L, C = q.shape
        S = k.shape[1]
        H = self.n_heads
        inv_d = 1.0 / self.d

        # attn_mask is passed in its natural shape/dtype (broadcastable to
        # (N, H, L, S)); no f32 broadcast materialization in the wrapper.
        if self._fusable and (q is k) and (k is v):
            qkv = linear(q.reshape(N * L, C), self.wqkv_t, self.bqkv)
            qkv = qkv.reshape(N, L, 3 * C)
            out = attention(qkv, qkv, qkv, attn_mask, n_heads=H, inv_d=inv_d,
                            C=C, q_cblk=0, k_cblk=1, v_cblk=2, out_dtype=q.dtype)
        elif self._fusable and (k is v):
            qp = linear(q.reshape(N * L, C), self.wq_t, self.bq).reshape(N, L, C)
            kv = linear(k.reshape(N * S, C), self.wkv_t, self.bkv)
            kv = kv.reshape(N, S, 2 * C)
            out = attention(qp, kv, kv, attn_mask, n_heads=H, inv_d=inv_d,
                            C=C, q_cblk=0, k_cblk=0, v_cblk=1, out_dtype=q.dtype)
        else:
            # Separate projections (no fused-output slicing copies either way).
            qp = linear(q.reshape(N * L, C), self.wq_t, self.bq).reshape(N, L, C)
            kp = linear(k.reshape(N * S, C), self.wk_t, self.bk).reshape(N, S, C)
            vp = linear(v.reshape(N * S, C), self.wv_t, self.bv).reshape(N, S, C)
            out = attention(qp, kp, vp, attn_mask, n_heads=H, inv_d=inv_d,
                            C=C, out_dtype=q.dtype)

        # TODO(synk): optionally fuse the output projection into the attention
        # kernel epilogue to save one (N, L, C) HBM round trip.
        out = linear(out.reshape(N * L, C), self.wo_t, self.bo).reshape(N, L, C)
        return out


# ----------------------------------------------------------------------------
# Pure-JAX reference (for correctness check)
# ----------------------------------------------------------------------------
def reference_forward(mha, q, k, v, attn_mask=None):
    N, L, C = q.shape
    S = k.shape[1]
    H, D = mha.n_heads, C // mha.n_heads
    qp = q @ mha.wq_t + mha.bq
    kp = k @ mha.wk_t + mha.bk
    vp = v @ mha.wv_t + mha.bv
    qh = qp.reshape(N, L, H, D).transpose(0, 2, 1, 3)
    kh = kp.reshape(N, S, H, D).transpose(0, 2, 1, 3)
    vh = vp.reshape(N, S, H, D).transpose(0, 2, 1, 3)
    attn = jnp.einsum("nhld,nhsd->nhls", qh / mha.d, kh)
    if attn_mask is not None:
        m = attn_mask.reshape((1,) * (4 - attn_mask.ndim) + attn_mask.shape)
        attn = attn + m
    attn = jax.nn.softmax(attn, axis=-1)
    out = jnp.einsum("nhls,nhsd->nhld", attn, vh)
    out = out.transpose(0, 2, 1, 3).reshape(N, L, C)
    return out @ mha.wo_t + mha.bo


if __name__ == "__main__":
    key = jax.random.PRNGKey(0)
    (k_param, k_q, k_k, k_v, k_m, k_x,
     k_param3, k_x3, k_m3, k_param4, k_x4) = jax.random.split(key, 11)

    # Case 1: cross-attention, C not a multiple of 128, full (N, H, L, S) mask.
    N, L, S, C, H = 2, 8, 8, 32, 4
    mha = MultiheadAttentionPallas(embed_dim=C, n_heads=H, key=k_param)
    q = jax.random.normal(k_q, (N, L, C), jnp.float32)
    k = jax.random.normal(k_k, (N, S, C), jnp.float32)
    v = jax.random.normal(k_v, (N, S, C), jnp.float32)
    attn_mask = jax.random.normal(k_m, (N, H, L, S), jnp.float32)

    out = jax.block_until_ready(mha(q, k, v, attn_mask))
    ref = reference_forward(mha, q, k, v, attn_mask)
    assert out.shape == (N, L, C)
    assert jnp.allclose(out, ref, atol=5e-3, rtol=5e-3), "mismatch (case 1)"

    # Case 2: self-attention, no mask -> mask-free kernel variant.
    x = jax.random.normal(k_x, (N, L, C), jnp.float32)
    out2 = jax.block_until_ready(mha(x, x, x, None))
    ref2 = reference_forward(mha, x, x, x, None)
    assert out2.shape == (N, L, C)
    assert jnp.allclose(out2, ref2, atol=5e-3, rtol=5e-3), "mismatch (case 2)"

    # Case 3: C % 128 == 0 -> fused QKV fed straight into attention, with a
    # broadcastable (1, 1, L, S) mask handled via the index_map (no broadcast).
    N3, L3, C3, H3 = 2, 16, 128, 4
    mha3 = MultiheadAttentionPallas(embed_dim=C3, n_heads=H3, key=k_param3)
    x3 = jax.random.normal(k_x3, (N3, L3, C3), jnp.float32)
    mask3 = jax.random.normal(k_m3, (1, 1, L3, L3), jnp.float32)
    out3 = jax.block_until_ready(mha3(x3, x3, x3, mask3))
    ref3 = reference_forward(mha3, x3, x3, x3, mask3)
    assert out3.shape == (N3, L3, C3)
    assert jnp.allclose(out3, ref3, atol=5e-3, rtol=5e-3), "mismatch (case 3)"

    # Case 4: head_dim == 128 -> lane-aligned per-head direct store epilogue.
    N4, L4, C4, H4 = 1, 16, 256, 2
    mha4 = MultiheadAttentionPallas(embed_dim=C4, n_heads=H4, key=k_param4)
    x4 = jax.random.normal(k_x4, (N4, L4, C4), jnp.float32)
    out4 = jax.block_until_ready(mha4(x4, x4, x4, None))
    ref4 = reference_forward(mha4, x4, x4, x4, None)
    assert out4.shape == (N4, L4, C4)
    assert jnp.allclose(out4, ref4, atol=5e-3, rtol=5e-3), "mismatch (case 4)"

    print("KERNEL_OK")
</pallas_src>

<mosaic_0001>
module attributes {stable_mosaic.version = 11 : i64} {
  func.func @_linear_kernel(%arg0: i32, %arg1: i32, %arg2: i32, %arg3: memref<16x32xf32, #tpu.memory_space<vmem>>, %arg4: memref<32x32xf32, #tpu.memory_space<vmem>>, %arg5: memref<1x32xf32, #tpu.memory_space<vmem>>, %arg6: memref<16x32xf32, #tpu.memory_space<vmem>>, %arg7: memref<16x32xf32, #tpu.memory_space<vmem>>) attributes {dimension_semantics = [#tpu.dimension_semantics<parallel>, #tpu.dimension_semantics<parallel>, #tpu.dimension_semantics<arbitrary>], iteration_bounds = array<i64: 1, 1, 1>, scalar_prefetch = 0 : i64, scratch_operands = 1 : i64, tpu.core_type = #tpu.core_type<tc>, window_params = [{transform_indices = @transform_0, window_bounds = array<i64: 16, 32>}, {transform_indices = @transform_1, window_bounds = array<i64: 32, 32>}, {transform_indices = @transform_2, window_bounds = array<i64: 1, 32>}, {transform_indices = @transform_3, window_bounds = array<i64: 16, 32>}]} {
    %c0_i32 = arith.constant 0 : i32
    %0 = arith.cmpi eq, %arg2, %c0_i32 : i32
    %1 = arith.extui %0 : i1 to i32
    %c0_i32_0 = arith.constant 0 : i32
    %2 = arith.cmpi ne, %1, %c0_i32_0 : i32
    scf.if %2 {
      %cst_10 = arith.constant 0.000000e+00 : f32
      %12 = vector.broadcast %cst_10 : f32 to vector<16x32xf32>
      %c0_11 = arith.constant 0 : index
      %c0_12 = arith.constant 0 : index
      %13 = vector.load %arg7[%c0_11, %c0_12] : memref<16x32xf32, #tpu.memory_space<vmem>>, vector<16x32xf32>
      tpu.vector_store %arg7[%c0_11, %c0_12], %12 {strides = array<i32>} : memref<16x32xf32, #tpu.memory_space<vmem>>, vector<16x32xf32>,
    } else {
    }
    %c0 = arith.constant 0 : index
    %c0_1 = arith.constant 0 : index
    %3 = vector.load %arg7[%c0, %c0_1] : memref<16x32xf32, #tpu.memory_space<vmem>>, vector<16x32xf32>
    %c0_2 = arith.constant 0 : index
    %c0_3 = arith.constant 0 : index
    %4 = vector.load %arg3[%c0_2, %c0_3] : memref<16x32xf32, #tpu.memory_space<vmem>>, vector<16x32xf32>
    %c0_4 = arith.constant 0 : index
    %c0_5 = arith.constant 0 : index
    %5 = vector.load %arg4[%c0_4, %c0_5] : memref<32x32xf32, #tpu.memory_space<vmem>>, vector<32x32xf32>
    %cst = arith.constant dense<0.000000e+00> : vector<16x32xf32>
    %6 = tpu.matmul %4, %5, %cst {dimension_numbers = #tpu.dot_dimension_numbers<[1], [0], [0], [1], [0, 0, 1, 1], [], []>} : vector<16x32xf32>, vector<32x32xf32>, vector<16x32xf32> -> vector<16x32xf32>
    %7 = arith.addf %3, %6 : vector<16x32xf32>
    %c0_6 = arith.constant 0 : index
    %c0_7 = arith.constant 0 : index
    %8 = vector.load %arg7[%c0_6, %c0_7] : memref<16x32xf32, #tpu.memory_space<vmem>>, vector<16x32xf32>
    tpu.vector_store %arg7[%c0_6, %c0_7], %7 {strides = array<i32>} : memref<16x32xf32, #tpu.memory_space<vmem>>, vector<16x32xf32>,
    %c0_i32_8 = arith.constant 0 : i32
    %9 = arith.cmpi eq, %arg2, %c0_i32_8 : i32
    %10 = arith.extui %9 : i1 to i32
    %c0_i32_9 = arith.constant 0 : i32
    %11 = arith.cmpi ne, %10, %c0_i32_9 : i32
    scf.if %11 {
      %c0_10 = arith.constant 0 : index
      %c0_11 = arith.constant 0 : index
      %12 = vector.load %arg7[%c0_10, %c0_11] : memref<16x32xf32, #tpu.memory_space<vmem>>, vector<16x32xf32>
      %c0_12 = arith.constant 0 : index
      %c0_13 = arith.constant 0 : index
      %13 = vector.load %arg5[%c0_12, %c0_13] : memref<1x32xf32, #tpu.memory_space<vmem>>, vector<1x32xf32>
      %14 = vector.broadcast %13 : vector<1x32xf32> to vector<16x32xf32>
      %15 = arith.addf %12, %14 : vector<16x32xf32>
      %c0_14 = arith.constant 0 : index
      %c0_15 = arith.constant 0 : index
      %16 = vector.load %arg6[%c0_14, %c0_15] : memref<16x32xf32, #tpu.memory_space<vmem>>, vector<16x32xf32>
      tpu.vector_store %arg6[%c0_14, %c0_15], %15 {strides = array<i32>} : memref<16x32xf32, #tpu.memory_space<vmem>>, vector<16x32xf32>,
    } else {
    }
    return
  }
  func.func @transform_0(%arg0: i32, %arg1: i32, %arg2: i32) -> (i32, i32) {
    %c0_i32 = arith.constant 0 : i32
    return %arg0, %arg2 : i32, i32
  }
  func.func @transform_1(%arg0: i32, %arg1: i32, %arg2: i32) -> (i32, i32) {
    %c0_i32 = arith.constant 0 : i32
    return %arg2, %arg1 : i32, i32
  }
  func.func @transform_2(%arg0: i32, %arg1: i32, %arg2: i32) -> (i32, i32) {
    %c0_i32 = arith.constant 0 : i32
    %c0_i32_0 = arith.constant 0 : i32
    return %c0_i32, %arg1 : i32, i32
  }
  func.func @transform_3(%arg0: i32, %arg1: i32, %arg2: i32) -> (i32, i32) {
    %c0_i32 = arith.constant 0 : i32
    return %arg0, %arg1 : i32, i32
  }
}

</mosaic_0001>

<bundles_post_ra>
// kernel: tpu_custom_call.1
= control target key start
LH: loop header
LB: loop body
LE: loop exit
PB: predicated region body
PF: predicated region fallthrough
CT: control target
= control target key end

     0   :  { %8 = vsyncpa [#allocation4], 0  ;;  %s366_s0 = inlined_call_operand.hbm [shape: f32[16,32], index: 0, kind: input, shape index: {}]   ;;  %s367_s1 = inlined_call_operand.hbm [shape: f32[32,32], index: 1, kind: input, shape index: {}]   ;;  %s368_s2 = inlined_call_operand.vmem [shape: f32[1,32], index: 2, kind: input, shape index: {}]   ;;  %s369_s3 = inlined_call_operand.hbm [shape: f32[16,32], index: 3, kind: output, shape index: {}]  }
   0x1   :  { %9 = vsyncpa [#allocation7], 0 }
   0x2   :  { %10 = vsyncpa [#allocation5], 0  ;;  %s284_s12 = smov [#allocation3]   ;;  %s212_s16 = scalar_lea.hbm %s366_s0, 256 }
   0x3   :  { %s16_s13 = sshll.u32 %s284_s12, 4  ;;  %p213_p0 = scmp.ne.s32.totalorder %s366_s0, %s212_s16  ;;  %s17_s13 = int_to_ptr.vmem [resolvable:$true] %s16_s13 }
   0x4   :  { %p216_p1 = scmp.lt.u32.totalorder %s212_s16, %s366_s0 }
   0x6   :  { %p218_p2 = pnand %p216_p1, %p213_p0 }
   0x8   :  { %221 = shalt.err (!%p218_p2)
}
   0x9   :  { %s222_s21 = scalar_lea.vmem %s17_s13, 256  ;;  %p227_p4 = scmp.lt.s32.totalorder %s17_s13, %s17_s13 }
   0xa   :  { %p223_p3 = scmp.ne.s32.totalorder %s17_s13, %s222_s21  ;;  %p228_p5 = scmp.lt.s32.totalorder %s222_s21, %s222_s21 }
   0xc   :  { %p229_p6 = por %p228_p5, %p227_p4 }
   0xe   :  { %p230_p7 = pnand %p229_p6, %p223_p3 }
  0x10   :  { %233 = shalt.err (!%p230_p7)
}
  0x11   :  { %s285_s22 = smov 128   ;;  %s286_s23 = smov 8  }
  0x12   :  { %22 = dma.hbm_to_vmem [thread:$0]  %s366_s0, 256, %s17_s13, [#allocation4], %s285_s22, %s285_s22, %s286_s23  }
  0x13   :  { %s287_s26 = smov [#allocation6]   ;;  %s234_s30 = scalar_lea.hbm %s367_s1, 512 }
  0x14   :  { %s28_s27 = sshll.u32 %s287_s26, 4  ;;  %p235_p8 = scmp.ne.s32.totalorder %s367_s1, %s234_s30  ;;  %s29_s27 = int_to_ptr.vmem [resolvable:$true] %s28_s27 }
  0x15   :  { %p238_p9 = scmp.lt.u32.totalorder %s234_s30, %s367_s1 }
  0x17   :  { %p240_p10 = pnand %p238_p9, %p235_p8 }
  0x19   :  { %243 = shalt.err (!%p240_p10)
}
  0x1a   :  { %s244_s8 = scalar_lea.vmem %s29_s27, 512  ;;  %p249_p12 = scmp.lt.s32.totalorder %s29_s27, %s29_s27 }
  0x1b   :  { %p245_p11 = scmp.ne.s32.totalorder %s29_s27, %s244_s8  ;;  %p250_p13 = scmp.lt.s32.totalorder %s244_s8, %s244_s8 }
  0x1d   :  { %p251_p0 = por %p250_p13, %p249_p12 }
  0x1f   :  { %p252_p1 = pnand %p251_p0, %p245_p11 }
  0x21   :  { %255 = shalt.err (!%p252_p1)
}
  0x22   :  { %34 = dma.hbm_to_vmem [thread:$0]  %s367_s1, 512, %s29_s27, [#allocation7], %s285_s22, %s285_s22, %s286_s23  }
  0x23   :  { %278 = dma.done.wait [#allocation4], 256  }
  0x24   :  { %279 = vsyncadd [#allocation4], 4294967040 }
  0x25   :  { %280 = dma.done.wait [#allocation7], 512  }
  0x26   :  { %281 = vsyncadd [#allocation7], 4294966784  ;;  %vm47_vm0 = vcmask 261120   ;;  %v288_v0 = vmov 0.0   ;;  %v54_v1 = vld [vmem:[#allocation6] sm:$0xff]  ;;  %v55_v2 = vld [vmem:[#allocation6 + $0x8] sm:$0xff] }
  0x27   :  { %49 = vst.msk [vmem:[#allocation2 + $0x8] sm:$0xff] %vm47_vm0, %v288_v0  ;;  %48 = vst.msk [vmem:[#allocation2] sm:$0xff] %vm47_vm0, %v288_v0  ;;  %v56_v3 = vld [vmem:[#allocation6 + $0x10] sm:$0xff]  ;;  %v198_v4 = vpack.c.bf16 %v55_v2, %v54_v1  ;;  %v57_v5 = vld [vmem:[#allocation6 + $0x18] sm:$0xff]  ;;  %s289_s11 = smov [#allocation8]  }
  0x28   :  { %v52_v6 = vld [vmem:[#allocation3] sm:$0xff]  ;;  %v202_v7 = vpack.c.bf16 %v57_v5, %v56_v3  ;;  %v53_v8 = vld [vmem:[#allocation3 + $0x8] sm:$0xff]  ;;  %v180_v15 = vld [vmem:[%s368_s2] ss:$0 sm:$0xff]  ;;  %s165_s12 = sshll.u32 %s289_s11, 4  ;;  %s166_s12 = int_to_ptr.vmem [resolvable:$true] %s165_s12 }
  0x29   :  { %195 = vmatprep.mubr.msk.f32.mxu0 %vm47_vm0, %v52_v6  ;;  %199 = vmatprep.subr.bf16.mxu0 %v198_v4  ;;  %s256_s13 = scalar_lea.vmem %s166_s12, 256  ;;  %p261_p3 = scmp.lt.s32.totalorder %s166_s12, %s166_s12 }
  0x2a   :  { %201 = vmatpush3.bf16.msra.mxu0 %v198_v4  ;;  %p257_p2 = scmp.ne.s32.totalorder %s166_s12, %s256_s13  ;;  %p262_p4 = scmp.lt.s32.totalorder %s256_s13, %s256_s13 }
  0x2b   :  { %203 = vmatprep.subr.bf16.mxu0 %v202_v7 }
  0x2c   :  { %p263_p5 = por %p262_p4, %p261_p3 }
  0x2e   :  { %205 = vmatpush3.bf16.msra.mxu0 %v202_v7  ;;  %v51_v9 = vld [vmem:[#allocation2 + $0x8] sm:$0xff]  ;;  %v50_v10 = vld [vmem:[#allocation2] sm:$0xff]  ;;  %p264_p6 = pnand %p263_p5, %p257_p2 }
  0x31   :  { %196 = vmatmul.mubr.msk.f32.vlgmr.msra.gmra.mrb[0].mxu0 %vm47_vm0, %v53_v8 }
 0x104   :  { %v197_v11 = vpop.f32.mrb[0].mxu0 }
 0x105   :  { %v141_v12 = vadd.f32 %v197_v11, %v51_v9  ;;  %v131_v13 = vpop.f32.mrb[1].mxu0 }
 0x106   :  { %v140_v14 = vadd.f32 %v131_v13, %v50_v10 }
 0x107   :  { %143 = vst.msk [vmem:[#allocation2 + $0x8] sm:$0xff] %vm47_vm0, %v141_v12 }
 0x108   :  { %142 = vst.msk [vmem:[#allocation2] sm:$0xff] %vm47_vm0, %v140_v14 }
 0x10e   :  { %v148_v16 = vld [vmem:[#allocation2 + $0x8] sm:$0xff] }
 0x10f   :  { %v147_v17 = vld [vmem:[#allocation2] sm:$0xff]  ;;  %v157_v18 = vadd.f32 %v180_v15, %v148_v16 }
 0x110   :  { %v156_v19 = vadd.f32 %v180_v15, %v147_v17 }
 0x111   :  { %159 = vst.msk [vmem:[#allocation8 + $0x8] sm:$0xff] %vm47_vm0, %v157_v18 }
 0x112   :  { %158 = vst.msk [vmem:[#allocation8] sm:$0xff] %vm47_vm0, %v156_v19 }
 0x113   :  { %267 = shalt.err (!%p264_p6)
}
 0x114   :  { %s268_s15 = scalar_lea.hbm %s369_s3, 256 }
 0x115   :  { %p269_p7 = scmp.ne.s32.totalorder %s369_s3, %s268_s15  ;;  %p272_p8 = scmp.lt.u32.totalorder %s268_s15, %s369_s3 }
 0x117   :  { %p274_p9 = pnand %p272_p8, %p269_p7 }
 0x119   :  { %277 = shalt.err (!%p274_p9)
}
 0x11a   :  { %171 = dma.vmem_to_hbm [thread:$0]  %s166_s12, 256, %s369_s3, [#allocation5], %s285_s22, %s285_s22, %s286_s23  }
 0x11b   :  { %282 = dma.done.wait [#allocation5], 256  }
 0x11c   :  { %283 = vsyncadd [#allocation5], 4294967040 }
 0x11d   :  { %175 = vsyncpa [#allocation4], 1 }
 0x11e   :  { %176 = vsyncpa [#allocation7], 1 }
 0x11f   :  { %177 = vsyncpa [#allocation5], 1 }

</bundles_post_ra>
